<compile_context>
chip_gen: v7x
topology: tpu7x:2x2x1
jax: 0.10.0
libtpu: 0.0.40
codegen_flags: <defaults>
</compile_context>

<pallas_src>
import functools

import jax
import jax.numpy as jnp
from jax import lax
from jax.experimental import pallas as pl
from jax.experimental.pallas import tpu as pltpu


_GJ_BLOCK = 64       # sweep / Gauss-Jordan block (review: 128 -> 64)
_SCHUR_PANEL = 512   # Schur column-panel width (multiple of _GJ_BLOCK)


def _tcr_kernel(emb_ref, idx_ref, sqs_ref, out_ref, gram_ref, *,
                n_rows, tn, d_eff, blk):
    i = pl.program_id(0)
    last = pl.num_programs(0) - 1

    @pl.when(i == 0)
    def _init():
        gram_ref[...] = jnp.zeros_like(gram_ref)

    # ------------- Phase 1: streaming scaled-Gram accumulation (HBM/MXU) -------------
    x = emb_ref[...].astype(jnp.float32)                                    # (tn, Dp)
    row_id = i * tn + lax.broadcasted_iota(jnp.int32, (tn, 1), 0)
    valid = jnp.logical_and(idx_ref[...] != -1, row_id < n_rows)            # (tn, 1)
    xm = jnp.where(valid, x, 0.0)                                           # select: NaN-safe mask
    sumsq = jnp.sum(xm * xm, axis=1, keepdims=True)                         # (tn, 1)
    rowscale = lax.rsqrt(sumsq + 1e-30) * sqs_ref[...]                      # normalize * sqrt(c)
    nx = (xm * rowscale).astype(jnp.bfloat16)                               # MXU-native, f32 accum
    gram_ref[...] += lax.dot_general(                                       # nX^T nX (row contraction)
        nx, nx, (((0,), (0,)), ((), ())), preferred_element_type=jnp.float32)

    # ------------- Phase 2: blocked pivot-free logdet (last step only) ---------------
    @pl.when(i == last)
    def _finalize():
        B = blk
        r_iota = lax.broadcasted_iota(jnp.int32, (B, B), 0)
        c_iota = lax.broadcasted_iota(jnp.int32, (B, B), 1)
        lane1 = lax.broadcasted_iota(jnp.int32, (1, B), 1)
        eye_b = (r_iota == c_iota).astype(jnp.float32)

        def sweep_step(k, carry):
            # One sweep-operator pivot on the register-carried (B,B) SPD block.
            # After B sweeps, M == -A11^{-1}; logdet accumulates sum(log pivot).
            M, ld = carry
            rowk = jnp.sum(jnp.where(r_iota == k, M, 0.0), axis=0, keepdims=True)   # (1, B)
            colk = jnp.sum(jnp.where(c_iota == k, M, 0.0), axis=1, keepdims=True)   # (B, 1)
            piv = jnp.sum(jnp.where(lane1 == k, rowk, 0.0), axis=1, keepdims=True)  # (1, 1)
            ld = ld + jnp.log(piv)                                                  # EUP
            inv_p = 1.0 / piv
            Mn = M - (colk * inv_p) * rowk                                          # rank-1 update
            is_r = r_iota == k
            is_c = c_iota == k
            Mn = jnp.where(is_r, rowk * inv_p, Mn)
            Mn = jnp.where(is_c, colk * inv_p, Mn)
            Mn = jnp.where(jnp.logical_and(is_r, is_c), -inv_p, Mn)
            return Mn, ld

        ld_total = jnp.zeros((1, 1), jnp.float32)
        for kb in range(d_eff // B):                                        # static block loop
            s = kb * B
            a11 = gram_ref[s:s + B, s:s + B] + eye_b                        # A11 = I + cG block
            m_fin, ld = lax.fori_loop(0, B, sweep_step,
                                      (a11, jnp.zeros((1, 1), jnp.float32)))
            ld_total = ld_total + ld
            inv11 = -m_fin                                                  # A11^{-1} (f32)
            t = s + B
            # Trailing Schur update: panel-tiled, block-upper-triangle only (MXU).
            for c0 in range(t, d_eff, _SCHUR_PANEL):
                c1 = min(c0 + _SCHUR_PANEL, d_eff)
                a12_c = gram_ref[s:s + B, c0:c1]                            # (B, c1-c0)
                w = jnp.dot(inv11, a12_c, preferred_element_type=jnp.float32)
                a12_r = gram_ref[s:s + B, t:c1]                             # (B, c1-t)
                upd = lax.dot_general(a12_r, w, (((0,), (0,)), ((), ())),
                                      preferred_element_type=jnp.float32)   # A12^T W
                gram_ref[t:c1, c0:c1] = gram_ref[t:c1, c0:c1] - upd

        out_ref[...] = -0.5 * ld_total                                      # -logdet/2


def _vmem_capacity_bytes():
    try:
        info = pltpu.get_tpu_info()
        cap = getattr(info, "vmem_capacity_bytes", None)
        if cap:
            return int(cap)
    except Exception:
        pass
    return 64 * 1024 * 1024            # conservative fallback: v7x per-TensorCore VMEM


def _vmem_estimate(tn, d_pad, itemsize):
    return (2 * tn * d_pad * itemsize          # double-buffered embedding tiles
            + 2 * tn * 128 * 4                 # idx tiles (lane-padded to 128)
            + d_pad * d_pad * 4                # Gram / A scratch
            + 4 * d_pad * _SCHUR_PANEL * 4     # Schur panel temporaries
            + (2 << 20))                       # headroom


def total_coding_rate(embeddings, idx, eps=0.01, tile_n=None):
    n, d = embeddings.shape
    d_pad = -(-d // 128) * 128                 # lane-dense storage pad
    d_eff = -(-d // _GJ_BLOCK) * _GJ_BLOCK     # factorization extent (skip fully padded blocks)
    if d_pad != d:
        embeddings = jnp.pad(embeddings, ((0, 0), (0, d_pad - d)))          # zero cols: logdet unchanged
    idx2 = idx.reshape(n, 1).astype(jnp.int32)

    # m and scalar computed outside the kernel; sqrt(scalar) folded into the per-row scale.
    m = jnp.sum((idx2 != -1).astype(jnp.float32))
    scalar = jnp.float32(d) * m / ((m + 1e-5) * (m + 1e-5) * jnp.float32(eps))
    sqrt_scalar = jnp.sqrt(scalar).reshape(1, 1).astype(jnp.float32)

    itemsize = embeddings.dtype.itemsize
    budget = int(0.85 * _vmem_capacity_bytes())                             # generation-aware cap

    n8 = -(-n // 8) * 8
    if tile_n is None:
        tn = min(8, n8)
        for cand in (4096, 2048, 1024, 512, 256, 128, 64, 32, 16, 8):
            c = min(cand, n8)
            if _vmem_estimate(c, d_pad, itemsize) <= int(0.75 * budget):
                tn = c
                break
    else:
        tn = min(tile_n, n8)
    tn = max(8, -(-tn // 8) * 8)

    grid = (pl.cdiv(n, tn),)
    kernel = functools.partial(_tcr_kernel, n_rows=n, tn=tn, d_eff=d_eff, blk=_GJ_BLOCK)

    vmem_limit = int(min(budget, max(2 * _vmem_estimate(tn, d_pad, itemsize),
                                     32 * 1024 * 1024)))

    cost = pl.CostEstimate(
        flops=int(2 * n * d_pad * d_pad + d_eff ** 3 // 3 + 6 * n * d_pad),
        transcendentals=int(n + d_eff),
        bytes_accessed=int(n * d_pad * itemsize + n * 4 + 8))

    out = pl.pallas_call(
        kernel,
        out_shape=jax.ShapeDtypeStruct((1, 1), jnp.float32),
        grid_spec=pltpu.PrefetchScalarGridSpec(
            num_scalar_prefetch=0,
            grid=grid,
            in_specs=[pl.BlockSpec((tn, d_pad), lambda i: (i, 0)),
                      pl.BlockSpec((tn, 1), lambda i: (i, 0)),
                      pl.BlockSpec((1, 1), lambda i: (0, 0))],
            out_specs=pl.BlockSpec((1, 1), lambda i: (0, 0)),
            scratch_shapes=[pltpu.VMEM((d_pad, d_pad), jnp.float32)]),      # scaled Gram / A
        compiler_params=pltpu.CompilerParams(
            dimension_semantics=("arbitrary",),
            vmem_limit_bytes=vmem_limit),
        cost_estimate=cost,
    )(embeddings, idx2, sqrt_scalar)
    return out[0, 0]


def _reference(embeddings, idx, eps=0.01):
    # Pure-JAX reference mirroring the PyTorch module (mask-and-zero form, f32 HIGHEST).
    emb = embeddings.astype(jnp.float32)
    mask = (idx != -1).astype(jnp.float32)[:, None]
    norm = jnp.sqrt(jnp.sum(emb * emb, axis=1, keepdims=True))
    nX = emb / jnp.maximum(norm, 1e-12) * mask
    m = jnp.sum(mask)
    p = embeddings.shape[1]
    scalar = p * m / ((m + 1e-5) * (m + 1e-5) * eps)
    G = jnp.dot(nX.T, nX, precision=lax.Precision.HIGHEST)
    A = jnp.eye(p, dtype=jnp.float32) + scalar * G
    _, logdet = jnp.linalg.slogdet(A)
    return -logdet / 2.0


if __name__ == "__main__":
    key = jax.random.PRNGKey(0)
    k1, k2, k3, k4 = jax.random.split(key, 4)

    # Test 1: small shape consistent with the module (N samples x D features).
    N, D = 8, 32
    emb = jax.random.normal(k1, (N, D), dtype=jnp.float32)
    idx = jnp.where(jax.random.uniform(k2, (N,)) < 0.25, -1, jnp.arange(N))
    out = jax.block_until_ready(total_coding_rate(emb, idx))
    ref = _reference(emb, idx)
    assert bool(jnp.isfinite(out)), out
    assert jnp.allclose(out, ref, rtol=5e-3, atol=5e-2), (out, ref)

    # Test 2: exercises the masked-row path and the multi-block sweep + panel-tiled
    # Schur update (D=160 -> d_pad=256, d_eff=192, three 64-blocks).
    N2, D2 = 600, 160
    emb2 = jax.random.normal(k3, (N2, D2), dtype=jnp.float32)
    idx2 = jnp.where(jax.random.uniform(k4, (N2,)) < 0.2, -1, jnp.arange(N2))
    out2 = jax.block_until_ready(total_coding_rate(emb2, idx2))
    ref2 = _reference(emb2, idx2)
    assert bool(jnp.isfinite(out2)), out2
    assert jnp.allclose(out2, ref2, rtol=5e-3, atol=5e-2), (out2, ref2)

    print("KERNEL_OK")
</pallas_src>

<mosaic_0001>
module attributes {stable_mosaic.version = 11 : i64} {
  func.func @_tcr_kernel(%arg0: i32, %arg1: memref<8x128xf32, #tpu.memory_space<vmem>>, %arg2: memref<8x1xi32, #tpu.memory_space<vmem>>, %arg3: memref<1x1xf32, #tpu.memory_space<vmem>>, %arg4: memref<1x1xf32, #tpu.memory_space<vmem>>, %arg5: memref<128x128xf32, #tpu.memory_space<vmem>>) attributes {dimension_semantics = [#tpu.dimension_semantics<arbitrary>], iteration_bounds = array<i64: 1>, scalar_prefetch = 0 : i64, scratch_operands = 1 : i64, tpu.core_type = #tpu.core_type<tc>, window_params = [{transform_indices = @transform_0, window_bounds = array<i64: 8, 128>}, {transform_indices = @transform_1, window_bounds = array<i64: 8, 1>}, {pipeline_mode = #tpu.pipeline_mode<synchronous>, transform_indices = @transform_2, window_bounds = array<i64: 1, 1>}, {pipeline_mode = #tpu.pipeline_mode<synchronous>, transform_indices = @transform_3, window_bounds = array<i64: 1, 1>}]} {
    %c0_i32 = arith.constant 0 : i32
    %0 = arith.cmpi eq, %arg0, %c0_i32 : i32
    %1 = arith.extui %0 : i1 to i32
    %c0_i32_0 = arith.constant 0 : i32
    %2 = arith.cmpi ne, %1, %c0_i32_0 : i32
    scf.if %2 {
      %cst_16 = arith.constant 0.000000e+00 : f32
      %37 = vector.broadcast %cst_16 : f32 to vector<128x128xf32>
      %c0_17 = arith.constant 0 : index
      %c0_18 = arith.constant 0 : index
      %38 = vector.load %arg5[%c0_17, %c0_18] : memref<128x128xf32, #tpu.memory_space<vmem>>, vector<128x128xf32>
      tpu.vector_store %arg5[%c0_17, %c0_18], %37 {strides = array<i32>} : memref<128x128xf32, #tpu.memory_space<vmem>>, vector<128x128xf32>,
    } else {
    }
    %c0 = arith.constant 0 : index
    %c0_1 = arith.constant 0 : index
    %3 = vector.load %arg1[%c0, %c0_1] : memref<8x128xf32, #tpu.memory_space<vmem>>, vector<8x128xf32>
    %c8_i32 = arith.constant 8 : i32
    %4 = arith.muli %arg0, %c8_i32 : i32
    %5 = tpu.iota {dimensions = array<i32: 0>} : vector<8x1xi32>
    %6 = vector.broadcast %4 : i32 to vector<8x1xi32>
    %7 = arith.addi %6, %5 : vector<8x1xi32>
    %c0_2 = arith.constant 0 : index
    %c0_3 = arith.constant 0 : index
    %8 = vector.load %arg2[%c0_2, %c0_3] : memref<8x1xi32, #tpu.memory_space<vmem>>, vector<8x1xi32>
    %c-1_i32 = arith.constant -1 : i32
    %9 = vector.broadcast %c-1_i32 : i32 to vector<8x1xi32>
    %10 = arith.cmpi ne, %8, %9 : vector<8x1xi32>
    %c8_i32_4 = arith.constant 8 : i32
    %11 = vector.broadcast %c8_i32_4 : i32 to vector<8x1xi32>
    %12 = arith.cmpi slt, %7, %11 : vector<8x1xi32>
    %13 = arith.andi %10, %12 : vector<8x1xi1>
    %cst = arith.constant 0.000000e+00 : f32
    %14 = vector.shape_cast %13 : vector<8x1xi1> to vector<8x1xi1>
    %15 = vector.broadcast %14 : vector<8x1xi1> to vector<8x128xi1>
    %16 = vector.broadcast %cst : f32 to vector<8x128xf32>
    %17 = arith.select %15, %3, %16 : vector<8x128xi1>, vector<8x128xf32>
    %18 = arith.mulf %17, %17 : vector<8x128xf32>
    %cst_5 = arith.constant dense<0.000000e+00> : vector<8xf32>
    %19 = vector.multi_reduction <add>, %18, %cst_5 [1] : vector<8x128xf32> to vector<8xf32>
    %20 = vector.shape_cast %19 : vector<8xf32> to vector<8x1xf32>
    %cst_6 = arith.constant 1.000000e-30 : f32
    %21 = vector.broadcast %cst_6 : f32 to vector<8x1xf32>
    %22 = arith.addf %20, %21 : vector<8x1xf32>
    %23 = math.rsqrt %22 : vector<8x1xf32>
    %c0_7 = arith.constant 0 : index
    %c0_8 = arith.constant 0 : index
    %24 = vector.load %arg3[%c0_7, %c0_8] : memref<1x1xf32, #tpu.memory_space<vmem>>, vector<1x1xf32>
    %25 = vector.broadcast %24 : vector<1x1xf32> to vector<8x1xf32>
    %26 = arith.mulf %23, %25 : vector<8x1xf32>
    %27 = vector.broadcast %26 : vector<8x1xf32> to vector<8x128xf32>
    %28 = arith.mulf %17, %27 : vector<8x128xf32>
    %29 = arith.truncf %28 : vector<8x128xf32> to vector<8x128xbf16>
    %c0_9 = arith.constant 0 : index
    %c0_10 = arith.constant 0 : index
    %30 = vector.load %arg5[%c0_9, %c0_10] : memref<128x128xf32, #tpu.memory_space<vmem>>, vector<128x128xf32>
    %cst_11 = arith.constant dense<0.000000e+00> : vector<128x128xf32>
    %31 = tpu.matmul %29, %29, %cst_11 {dimension_numbers = #tpu.dot_dimension_numbers<[0], [0], [1], [1], [0, 1, 1, 1], [], []>} : vector<8x128xbf16>, vector<8x128xbf16>, vector<128x128xf32> -> vector<128x128xf32>
    %32 = arith.addf %30, %31 : vector<128x128xf32>
    %c0_12 = arith.constant 0 : index
    %c0_13 = arith.constant 0 : index
    %33 = vector.load %arg5[%c0_12, %c0_13] : memref<128x128xf32, #tpu.memory_space<vmem>>, vector<128x128xf32>
    tpu.vector_store %arg5[%c0_12, %c0_13], %32 {strides = array<i32>} : memref<128x128xf32, #tpu.memory_space<vmem>>, vector<128x128xf32>,
    %c0_i32_14 = arith.constant 0 : i32
    %34 = arith.cmpi eq, %arg0, %c0_i32_14 : i32
    %35 = arith.extui %34 : i1 to i32
    %c0_i32_15 = arith.constant 0 : i32
    %36 = arith.cmpi ne, %35, %c0_i32_15 : i32
    scf.if %36 {
      %37 = tpu.iota {dimensions = array<i32: 0>} : vector<64x64xi32>
      %38 = tpu.iota {dimensions = array<i32: 1>} : vector<64x64xi32>
      %39 = tpu.iota {dimensions = array<i32: 1>} : vector<1x64xi32>
      %40 = arith.cmpi eq, %37, %38 : vector<64x64xi32>
      %41 = arith.extui %40 : vector<64x64xi1> to vector<64x64xi32>
      %42 = arith.sitofp %41 : vector<64x64xi32> to vector<64x64xf32>
      %cst_16 = arith.constant 0.000000e+00 : f32
      %43 = vector.broadcast %cst_16 : f32 to vector<1x1xf32>
      %c0_17 = arith.constant 0 : index
      %c0_18 = arith.constant 0 : index
      %44 = vector.load %arg5[%c0_17, %c0_18] : memref<128x128xf32, #tpu.memory_space<vmem>>, vector<64x64xf32>
      %45 = arith.addf %44, %42 : vector<64x64xf32>
      %cst_19 = arith.constant 0.000000e+00 : f32
      %46 = vector.broadcast %cst_19 : f32 to vector<1x1xf32>
      %c0_i32_20 = arith.constant 0 : i32
      %c64_i32 = arith.constant 64 : i32
      %47 = arith.addi %c0_i32_20, %c64_i32 : i32
      %c1_i32 = arith.constant 1 : i32
      %48:2 = scf.for %arg6 = %c0_i32_20 to %47 step %c1_i32 iter_args(%arg7 = %45, %arg8 = %46) -> (vector<64x64xf32>, vector<1x1xf32>)  : i32 {
        %53 = vector.broadcast %arg6 : i32 to vector<64x64xi32>
        %54 = arith.cmpi eq, %37, %53 : vector<64x64xi32>
        %cst_25 = arith.constant 0.000000e+00 : f32
        %55 = vector.broadcast %cst_25 : f32 to vector<64x64xf32>
        %56 = arith.select %54, %arg7, %55 : vector<64x64xi1>, vector<64x64xf32>
        %cst_26 = arith.constant dense<0.000000e+00> : vector<64xf32>
        %57 = vector.multi_reduction <add>, %56, %cst_26 [0] : vector<64x64xf32> to vector<64xf32>
        %58 = vector.shape_cast %57 : vector<64xf32> to vector<1x64xf32>
        %59 = vector.broadcast %arg6 : i32 to vector<64x64xi32>
        %60 = arith.cmpi eq, %38, %59 : vector<64x64xi32>
        %cst_27 = arith.constant 0.000000e+00 : f32
        %61 = vector.broadcast %cst_27 : f32 to vector<64x64xf32>
        %62 = arith.select %60, %arg7, %61 : vector<64x64xi1>, vector<64x64xf32>
        %cst_28 = arith.constant dense<0.000000e+00> : vector<64xf32>
        %63 = vector.multi_reduction <add>, %62, %cst_28 [1] : vector<64x64xf32> to vector<64xf32>
        %64 = vector.shape_cast %63 : vector<64xf32> to vector<64x1xf32>
        %65 = vector.broadcast %arg6 : i32 to vector<1x64xi32>
        %66 = arith.cmpi eq, %39, %65 : vector<1x64xi32>
        %cst_29 = arith.constant 0.000000e+00 : f32
        %67 = vector.broadcast %cst_29 : f32 to vector<1x64xf32>
        %68 = arith.select %66, %58, %67 : vector<1x64xi1>, vector<1x64xf32>
        %cst_30 = arith.constant dense<0.000000e+00> : vector<1xf32>
        %69 = vector.multi_reduction <add>, %68, %cst_30 [1] : vector<1x64xf32> to vector<1xf32>
        %70 = vector.shape_cast %69 : vector<1xf32> to vector<1x1xf32>
        %71 = math.log %70 : vector<1x1xf32>
        %72 = arith.addf %arg8, %71 : vector<1x1xf32>
        %cst_31 = arith.constant 1.000000e+00 : f32
        %73 = vector.broadcast %cst_31 : f32 to vector<1x1xf32>
        %74 = arith.divf %73, %70 : vector<1x1xf32>
        %75 = vector.broadcast %74 : vector<1x1xf32> to vector<64x1xf32>
        %76 = arith.mulf %64, %75 : vector<64x1xf32>
        %77 = vector.broadcast %76 : vector<64x1xf32> to vector<64x64xf32>
        %78 = vector.broadcast %58 : vector<1x64xf32> to vector<64x64xf32>
        %79 = arith.mulf %77, %78 : vector<64x64xf32>
        %80 = arith.subf %arg7, %79 : vector<64x64xf32>
        %81 = vector.broadcast %arg6 : i32 to vector<64x64xi32>
        %82 = arith.cmpi eq, %37, %81 : vector<64x64xi32>
        %83 = vector.broadcast %arg6 : i32 to vector<64x64xi32>
        %84 = arith.cmpi eq, %38, %83 : vector<64x64xi32>
        %85 = vector.broadcast %74 : vector<1x1xf32> to vector<1x64xf32>
        %86 = arith.mulf %58, %85 : vector<1x64xf32>
        %87 = vector.shape_cast %86 : vector<1x64xf32> to vector<1x64xf32>
        %88 = vector.broadcast %87 : vector<1x64xf32> to vector<64x64xf32>
        %89 = arith.select %82, %88, %80 : vector<64x64xi1>, vector<64x64xf32>
        %90 = vector.broadcast %74 : vector<1x1xf32> to vector<64x1xf32>
        %91 = arith.mulf %64, %90 : vector<64x1xf32>
        %92 = vector.shape_cast %91 : vector<64x1xf32> to vector<64x1xf32>
        %93 = vector.broadcast %92 : vector<64x1xf32> to vector<64x64xf32>
        %94 = arith.select %84, %93, %89 : vector<64x64xi1>, vector<64x64xf32>
        %95 = arith.andi %82, %84 : vector<64x64xi1>
        %cst_32 = arith.constant 0.000000e+00 : f32
        %96 = vector.broadcast %cst_32 : f32 to vector<1x1xf32>
        %97 = arith.subf %96, %74 : vector<1x1xf32>
        %98 = vector.shape_cast %97 : vector<1x1xf32> to vector<1x1xf32>
        %99 = vector.broadcast %98 : vector<1x1xf32> to vector<64x64xf32>
        %100 = arith.select %95, %99, %94 : vector<64x64xi1>, vector<64x64xf32>
        scf.yield %100, %72 : vector<64x64xf32>, vector<1x1xf32>
      }
      %c64_i32_21 = arith.constant 64 : i32
      %49 = arith.addf %43, %48#1 : vector<1x1xf32>
      %cst_22 = arith.constant -5.000000e-01 : f32
      %50 = vector.broadcast %cst_22 : f32 to vector<1x1xf32>
      %51 = arith.mulf %50, %49 : vector<1x1xf32>
      %c0_23 = arith.constant 0 : index
      %c0_24 = arith.constant 0 : index
      %52 = vector.load %arg4[%c0_23, %c0_24] : memref<1x1xf32, #tpu.memory_space<vmem>>, vector<1x1xf32>
      tpu.vector_store %arg4[%c0_23, %c0_24], %51 {strides = array<i32>} : memref<1x1xf32, #tpu.memory_space<vmem>>, vector<1x1xf32>,
    } else {
    }
    return
  }
  func.func @transform_0(%arg0: i32) -> (i32, i32) {
    %c0_i32 = arith.constant 0 : i32
    %c0_i32_0 = arith.constant 0 : i32
    return %arg0, %c0_i32 : i32, i32
  }
  func.func @transform_1(%arg0: i32) -> (i32, i32) {
    %c0_i32 = arith.constant 0 : i32
    %c0_i32_0 = arith.constant 0 : i32
    return %arg0, %c0_i32 : i32, i32
  }
  func.func @transform_2(%arg0: i32) -> (i32, i32) {
    %c0_i32 = arith.constant 0 : i32
    %c0_i32_0 = arith.constant 0 : i32
    %c0_i32_1 = arith.constant 0 : i32
    return %c0_i32, %c0_i32_0 : i32, i32
  }
  func.func @transform_3(%arg0: i32) -> (i32, i32) {
    %c0_i32 = arith.constant 0 : i32
    %c0_i32_0 = arith.constant 0 : i32
    %c0_i32_1 = arith.constant 0 : i32
    return %c0_i32, %c0_i32_0 : i32, i32
  }
}

</mosaic_0001>

<bundles_post_ra>
// kernel: tpu_custom_call.1
= control target key start
LH: loop header
LB: loop body
LE: loop exit
PB: predicated region body
PF: predicated region fallthrough
CT: control target
= control target key end

     0   :  { %s1138_s0 = inlined_call_operand.vmem [shape: f32[8,128], index: 0, kind: input, shape index: {}]   ;;  %s1139_s1 = inlined_call_operand.vmem [shape: s32[8,1], index: 1, kind: input, shape index: {}]   ;;  %s1140_s2 = inlined_call_operand.<no memory space> [shape: f32[1,1], index: 2, kind: input, shape index: {}]   ;;  %s1141_s3 = inlined_call_operand.hbm [shape: f32[1,1], index: 3, kind: output, shape index: {}]  }
   0x1   :  { %v8_v0 = vstv %s1140_s2 }
   0x2   :  { %9 = vst [vmem:[#allocation3] sm:$0x1] %v8_v0 }
   0x3   :  { %v44_v1 = vld [vmem:[%s1139_s1] sm:$0xff] }
   0x4   :  { %10 = vsyncpa [#allocation5], 0  ;;  %v763_v2 = vmov 0   ;;  %vm45_vm0 = vcmp.ne.s32.totalorder %v44_v1, 4294967295  ;;  %v38_v4 = vld [vmem:[%s1138_s0] sm:$0xff]  ;;  %vm131_vm2 = vcmask 1043456   ;;  %v40_v25 = vlaneseq }
   0x5   :  { %651 = vset.pattern.permute.xlu0 %v763_v2  ;;  %652 = vset.pattern.permute.xlu1 %v763_v2  ;;  %v48_v3 = vsel %vm45_vm0, 1, %v763_v2  ;;  %vm106_vm3 = vcmask 64512   ;;  %v764_v31 = vmov 0.0   ;;  %s862_s0 = smov 0  }
   0x6   :  { %50 = vperm.xlu0 %651, %v48_v3   ;;  %v803_v26 = vshrl.u32 %v40_v25, 7  ;;  %v808_v28 = vand.u32 127, %v40_v25 }
   0x8   :  { %v806_v27 = vadd.s32 16, %v803_v26  ;;  %v811_v29 = vadd.s32 24, %v803_v26  ;;  %v814_v30 = vadd.s32 8, %v803_v26  ;;  %vm276_vm5 = vcmp.eq.s32.totalorder %v803_v26, %v808_v28 }
   0x9   :  { %v520_v10 = vld [vmem:[#allocation3] ss:$0 sm:$0xff]  ;;  %v529_v33 = vsel %vm276_vm5, 1.0, %v764_v31  ;;  %v825_v34 = vadd.s32 48, %v803_v26  ;;  %v828_v37 = vadd.s32 32, %v803_v26  ;;  %v831_v41 = vadd.s32 56, %v803_v26 }
   0xa   :  { %vm278_vm4 = vcmp.eq.s32.totalorder %v806_v27, %v808_v28  ;;  %vm279_vm6 = vcmp.eq.s32.totalorder %v811_v29, %v808_v28  ;;  %vm277_vm7 = vcmp.eq.s32.totalorder %v814_v30, %v808_v28  ;;  %v834_v44 = vadd.s32 40, %v803_v26 }
   0xb   :  { %v531_v32 = vsel %vm278_vm4, 1.0, %v764_v31  ;;  %v532_v36 = vsel %vm279_vm6, 1.0, %v764_v31  ;;  %v530_v40 = vsel %vm277_vm7, 1.0, %v764_v31  ;;  %vm282_vm8 = vcmp.eq.s32.totalorder %v825_v34, %v808_v28 }
   0xc   :  { %vm280_vm9 = vcmp.eq.s32.totalorder %v828_v37, %v808_v28  ;;  %vm283_vm10 = vcmp.eq.s32.totalorder %v831_v41, %v808_v28  ;;  %v535_v48 = vsel %vm282_vm8, 1.0, %v764_v31  ;;  %vm281_vm11 = vcmp.eq.s32.totalorder %v834_v44, %v808_v28 }
   0xd   :  { %v533_v49 = vsel %vm280_vm9, 1.0, %v764_v31  ;;  %v536_v51 = vsel %vm283_vm10, 1.0, %v764_v31  ;;  %v534_v54 = vsel %vm281_vm11, 1.0, %v764_v31 }
  0x85   :  { %v51_v5 = vpop.permute.xlu0 %50 }
  0x86   :  { %vm52_vm1 = vcmp.eq.s32.totalorder %v51_v5, 1 }
  0x87   :  { %v53_v6 = vsel %vm52_vm1, %v38_v4, 0.0  ;;  %v844_v4 = vmov 0.0  }
  0x88   :  { %v54_v7 = vmul.f32 %v53_v6, %v53_v6 }
  0x8a   :  { %55 = vadd.xlane.f32.xlu0 %v54_v7 }
 0x117   :  { %v56_v8 = vpop.xlane.xlu0 %55 }
 0x118   :  { %v57_v9 = vadd.f32 1e-30, %v56_v8 }
 0x11a   :  { %653 = vrsqrt.f32 %v57_v9 }
 0x124   :  { %v654_v11 = vpop.eup %653 }
 0x125   :  { %v66_v12 = vmul.f32 %v654_v11, %v520_v10 }
 0x127   :  { %69 = vperm.xlu1 %652, %v66_v12  }
 0x1a6   :  { %v70_v13 = vpop.permute.xlu1 %69 }
 0x1a7   :  { %v72_v14 = vmul.f32 %v70_v13, %v53_v6 }
 0x1a9   :  { %v73_v15 = vpack.c.bf16 %v72_v14, %v72_v14 }
 0x1ab   :  { %90 = vxpose.xlu1.c.b16.start.end [1/1] (short) %v73_v15, 128  ;;  %566 = vmatprep.subr.msk.bf16.mxu0 %vm131_vm2, %v73_v15  ;;  %v133_v16 = vsel %vm131_vm2, %v73_v15, 0 }
 0x1ac   :  { %567 = vmatprep.subr.msk.bf16.mxu1 %vm131_vm2, %v73_v15  ;;  %547 = vmatpush3.bf16.msra.mxu0 %v133_v16 }
 0x1ad   :  { %565 = vmatpush3.bf16.msra.mxu1 %v133_v16 }
 0x211   :  { %v98_v17 = vpop.trf.xlu1 }
 0x212   :  { %548 = vmatprep.mubr.msk.bf16.mxu0 %vm106_vm3, %v98_v17 }
 0x215   :  { %v99_v18 = vpop.trf.xlu1 }
 0x216   :  { %549 = vmatmul.mubr.msk.bf16.vlgmr.msra.gmra.mrb[0].mxu0 %vm106_vm3, %v99_v18 }
 0x219   :  { %v100_v19 = vpop.trf.xlu1 }
 0x21a   :  { %552 = vmatprep.mubr.msk.bf16.mxu0 %vm106_vm3, %v100_v19 }
 0x21d   :  { %v101_v20 = vpop.trf.xlu1 }
 0x21e   :  { %553 = vmatmul.mubr.msk.bf16.gmra.mrb[4].mxu0 %vm106_vm3, %v101_v20 }
 0x221   :  { %v102_v21 = vpop.trf.xlu1 }
 0x222   :  { %556 = vmatprep.mubr.msk.bf16.mxu1 %vm106_vm3, %v102_v21 }
 0x225   :  { %v103_v22 = vpop.trf.xlu1 }
 0x226   :  { %557 = vmatmul.mubr.msk.bf16.vlgmr.msra.gmra.mrb[0].mxu1 %vm106_vm3, %v103_v22 }
 0x229   :  { %v104_v23 = vpop.trf.xlu1 }
 0x22a   :  { %560 = vmatprep.mubr.msk.bf16.mxu1 %vm106_vm3, %v104_v23 }
 0x22d   :  { %v105_v24 = vpop.trf.xlu1 }
 0x22e   :  { %561 = vmatmul.mubr.msk.bf16.gmra.mrb[4].mxu1 %vm106_vm3, %v105_v24 }
 0x2e9   :  { %v550_v35 = vpop.f32.mrb[0].mxu0 }
 0x2ea   :  { %v310_v38 = vadd.f32 %v550_v35, %v531_v32   ;;  %v169_v39 = vpop.f32.mrb[1].mxu0 }
 0x2eb   :  { %v308_v42 = vadd.f32 %v529_v33, %v169_v39   ;;  %v551_v43 = vpop.f32.mrb[2].mxu0 }
 0x2ec   :  { %v311_v45 = vadd.f32 %v551_v43, %v532_v36   ;;  %v172_v46 = vpop.f32.mrb[3].mxu0 }
 0x2ed   :  { %v309_v47 = vadd.f32 %v530_v40, %v172_v46  }
 0x2f1   :  { %v554_v50 = vpop.f32.mrb[4].mxu0 }
 0x2f2   :  { %v314_v52 = vadd.f32 %v554_v50, %v535_v48   ;;  %v185_v53 = vpop.f32.mrb[5].mxu0 }
 0x2f3   :  { %v312_v55 = vadd.f32 %v533_v49, %v185_v53   ;;  %v555_v56 = vpop.f32.mrb[6].mxu0 }
 0x2f4   :  { %v315_v57 = vadd.f32 %v555_v56, %v536_v51   ;;  %v188_v58 = vpop.f32.mrb[7].mxu0 }
 0x2f5   :  { %v313_v59 = vadd.f32 %v534_v54, %v188_v58  }
 0x2f9   :  { %v558_v60 = vpop.f32.mrb[0].mxu1 }
 0x2fa   :  { %v201_v61 = vpop.f32.mrb[1].mxu1 }
 0x2fb   :  { %v559_v62 = vpop.f32.mrb[2].mxu1 }
 0x2fc   :  { %v204_v63 = vpop.f32.mrb[3].mxu1 }
 0x301   :  { %v562_v0 = vpop.f32.mrb[4].mxu1 }
 0x302   :  { %v217_v1 = vpop.f32.mrb[5].mxu1 }
 0x303   :  { %v563_v2 = vpop.f32.mrb[6].mxu1 }
 0x304   :  { %v220_v3 = vpop.f32.mrb[7].mxu1 }
 0x305 LB: > { %v895_v5 = vstv %s761_s0  ;;  %vm348_vm14 = vcmask 523264   ;;  %s321_s0 = sadd.s32 1, %s761_s0   ;;  %s761_s0 = sphi %s862_s0, %s321_s0   ;;  %v757_v42 = vphi %v308_v42, %v1153_v42   ;;  %v753_v47 = vphi %v309_v47, %v463_v47   ;;  %v749_v38 = vphi %v310_v38, %v464_v38   ;;  %v745_v45 = vphi %v311_v45, %v1152_v45   ;;  %v741_v55 = vphi %v312_v55, %v466_v55   ;;  %v737_v59 = vphi %v313_v59, %v467_v59   ;;  %v733_v52 = vphi %v314_v52, %v468_v52   ;;  %v729_v57 = vphi %v315_v57, %v469_v57   ;;  %v725_v4 = vphi %v844_v4, %v1151_v4  }
 0x306   : > { %vm332_vm12 = vcmp.eq.s32.totalorder %v803_v26, %v895_v5  ;;  %vm901_vm13 = vcmp.eq.s32.totalorder %v808_v28, %v895_v5  ;;  %vm333_vm15 = vcmp.eq.s32.totalorder %v814_v30, %v895_v5  ;;  %vm334_vm0 = vcmp.eq.s32.totalorder %v806_v27, %v895_v5  ;;  %p318_p0 = scmp.ge.s32.totalorder %s321_s0, 64  }
 0x307   : > { %v371_v7 = vsel %vm901_vm13, %v757_v42, 0.0  ;;  %v340_v9 = vsel %vm332_vm12, %v757_v42, 0.0  ;;  %vm335_vm1 = vcmp.eq.s32.totalorder %v811_v29, %v895_v5  ;;  %v372_v10 = vsel %vm901_vm13, %v753_v47, 0.0  ;;  %vm1002_vm6 = vmand %vm332_vm12, %vm901_vm13  ;;  %s765_s1 = smov (%p318_p0), [#allocation4]  }
 0x308   : > { %v379_v8 = vsel %vm348_vm14, %v371_v7, 0.0  ;;  %vm336_vm2 = vcmp.eq.s32.totalorder %v828_v37, %v895_v5  ;;  %v382_v11 = vsel %vm348_vm14, %v372_v10, 0.0  ;;  %v349_v12 = vsel %vm348_vm14, %v340_v9, 0.0  ;;  %vm1011_vm7 = vmand %vm333_vm15, %vm901_vm13  ;;  %s480_s2 = sshll.u32 (%p318_p0), %s765_s1, 4  ;;  %s481_s2 = int_to_ptr.vmem [resolvable:$true] %s480_s2 }
 0x309   : > { %380 = vadd.xlane.f32.xlu0 %v379_v8  ;;  %383 = vadd.xlane.f32.xlu1 %v382_v11  ;;  %v341_v13 = vsel %vm333_vm15, %v753_v47, 0.0  ;;  %v342_v14 = vsel %vm334_vm0, %v749_v38, 0.0  ;;  %v343_v15 = vsel %vm335_vm1, %v745_v45, 0.0  ;;  %vm337_vm3 = vcmp.eq.s32.totalorder %v834_v44, %v895_v5  ;;  %vm1023_vm8 = vmand %vm334_vm0, %vm901_vm13  ;;  %s659_s18 = scalar_lea.vmem (%p318_p0), %s481_s2, 16  ;;  %s663_s19 = scalar_lea.vmem (%p318_p0), %s481_s2, 32 }
 0x30a   : > { %v350_v16 = vsel %vm348_vm14, %v341_v13, 0.0  ;;  %v352_v17 = vsel %vm348_vm14, %v342_v14, 0.0  ;;  %vm338_vm4 = vcmp.eq.s32.totalorder %v825_v34, %v895_v5  ;;  %v344_v18 = vsel %vm336_vm2, %v741_v55, 0.0  ;;  %vm456_vm9 = vmand %vm335_vm1, %vm901_vm13  ;;  %p660_p1 = scmp.ne.s32.totalorder (%p318_p0), %s481_s2, %s659_s18  ;;  %p664_p2 = scmp.lt.s32.totalorder (%p318_p0), %s481_s2, %s481_s2 }
 0x30b   : > { %v351_v19 = vadd.f32 %v350_v16, %v349_v12  ;;  %v354_v20 = vsel %vm348_vm14, %v343_v15, 0.0  ;;  %v373_v21 = vsel %vm901_vm13, %v749_v38, 0.0  ;;  %v375_v22 = vsel %vm901_vm13, %v741_v55, 0.0  ;;  %vm457_vm10 = vmand %vm336_vm2, %vm901_vm13  ;;  %p665_p3 = scmp.lt.s32.totalorder (%p318_p0), %s663_s19, %s659_s18 }
 0x30c   : > { %v345_v23 = vsel %vm337_vm3, %v737_v59, 0.0  ;;  %v385_v25 = vsel %vm348_vm14, %v373_v21, 0.0  ;;  %vm339_vm5 = vcmp.eq.s32.totalorder %v831_v41, %v895_v5  ;;  %v356_v31 = vsel %vm348_vm14, %v344_v18, 0.0  ;;  %vm458_vm11 = vmand %vm337_vm3, %vm901_vm13 }
 0x30d   : > { %v353_v24 = vadd.f32 %v352_v17, %v351_v19  ;;  %386 = vadd.xlane.f32.xlu1 %v385_v25  ;;  %v346_v32 = vsel %vm338_vm4, %v733_v52, 0.0  ;;  %v391_v35 = vsel %vm348_vm14, %v375_v22, 0.0  ;;  %v358_v36 = vsel %vm348_vm14, %v345_v23, 0.0  ;;  %p666_p4 = por (%p318_p0), %p665_p3, %p664_p2 }
 0x30e   : > { %v377_v39 = vsel %vm901_vm13, %v733_v52, 0.0  ;;  %v347_v40 = vsel %vm339_vm5, %v729_v57, 0.0  ;;  %v360_v46 = vsel %vm348_vm14, %v346_v32, 0.0  ;;  %v374_v0 = vsel %vm901_vm13, %v745_v45, 0.0 }
 0x30f   : > { %v355_v33 = vadd.f32 %v354_v20, %v353_v24  ;;  %v397_v49 = vsel %vm348_vm14, %v377_v39, 0.0  ;;  %v362_v50 = vsel %vm348_vm14, %v347_v40, 0.0  ;;  %v388_v2 = vsel %vm348_vm14, %v374_v0, 0.0  ;;  %p667_p5 = pnand (%p318_p0), %p666_p4, %p660_p1 }
 0x310   : > { %v376_v3 = vsel %vm901_vm13, %v737_v59, 0.0  ;;  %v378_v8 = vsel %vm901_vm13, %v729_v57, 0.0 }
 0x311   : > { %v357_v43 = vadd.f32 %v356_v31, %v355_v33  ;;  %392 = vadd.xlane.f32.xlu1 %v391_v35  ;;  %v394_v7 = vsel %vm348_vm14, %v376_v3, 0.0  ;;  %v400_v9 = vsel %vm348_vm14, %v378_v8, 0.0 }
 0x313   : > { %v359_v48 = vadd.f32 %v358_v36, %v357_v43 }
 0x315   : > { %v361_v51 = vadd.f32 %v360_v46, %v359_v48  ;;  %398 = vadd.xlane.f32.xlu1 %v397_v49 }
 0x317   : > { %v363_v53 = vadd.f32 %v362_v50, %v361_v51 }
 0x319   : > { %v364_v54 = vrot.slane %v363_v53, 4 }
 0x31b   : > { %v365_v56 = vadd.f32 %v364_v54, %v363_v53 }
 0x31d   : > { %v366_v58 = vrot.slane %v365_v56, 2 }
 0x31f   : > { %v367_v60 = vadd.f32 %v366_v58, %v365_v56 }
 0x321   : > { %v368_v61 = vrot.slane %v367_v60, 1 }
 0x323   : > { %v369_v62 = vadd.f32 %v368_v61, %v367_v60 }
 0x325   : > { %v403_v63 = vsel %vm901_vm13, %v369_v62, 0.0 }
 0x326   : > { %v404_v1 = vsel %vm348_vm14, %v403_v63, 0.0  ;;  %vm460_vm14 = vmand %vm339_vm5, %vm901_vm13 }
 0x327   : > { %405 = vadd.xlane.f32.xlu0 %v404_v1 }
 0x32b   : > { %389 = vadd.xlane.f32.xlu0 %v388_v2 }
 0x32f   : > { %395 = vadd.xlane.f32.xlu0 %v394_v7 }
 0x333   : > { %401 = vadd.xlane.f32.xlu0 %v400_v9 }
 0x396   : > { %v381_v10 = vpop.xlane.xlu0 %380  ;;  %v384_v11 = vpop.xlane.xlu1 %383 }
 0x39a   : > { %v387_v13 = vpop.xlane.xlu1 %386 }
 0x39e   : > { %v393_v15 = vpop.xlane.xlu1 %392 }
 0x3a2   : > { %v399_v24 = vpop.xlane.xlu1 %398 }
 0x3b4   : > { %v406_v12 = vpop.xlane.xlu0 %405 }
 0x3b5   : > { %655 = vlog2.f32 %v406_v12 }
 0x3b6   : > { %657 = vrcp.f32 %v406_v12 }
 0x3b8   : > { %v390_v14 = vpop.xlane.xlu0 %389 }
 0x3bc   : > { %v396_v16 = vpop.xlane.xlu0 %395 }
 0x3bf   : > { %v656_v17 = vpop.eup %655 }
 0x3c0   : > { %v658_v18 = vpop.eup %657  ;;  %v408_v19 = vmul.f32 0.6931472, %v656_v17  ;;  %v402_v25 = vpop.xlane.xlu0 %401 }
 0x3c1   : > { %v412_v20 = vmul.f32 %v658_v18, %v381_v10  ;;  %v413_v21 = vmul.f32 %v658_v18, %v384_v11  ;;  %v414_v22 = vmul.f32 %v658_v18, %v387_v13  ;;  %v436_v23 = vmul.f32 %v658_v18, %v369_v62 }
 0x3c2   : > { %v995_v4 = vadd.f32 %v725_v4, %v408_v19   ;;  %v461_v32 = vsub.f32 0.0, %v658_v18  ;;  %v415_v33 = vmul.f32 %v658_v18, %v390_v14  ;;  %v416_v35 = vmul.f32 %v658_v18, %v393_v15 }
 0x3c3   : > { %v420_v36 = vmul.f32 %v412_v20, %v369_v62  ;;  %v421_v39 = vmul.f32 %v413_v21, %v369_v62  ;;  %v422_v40 = vmul.f32 %v414_v22, %v369_v62  ;;  %v417_v43 = vmul.f32 %v658_v18, %v396_v16 }
 0x3c4   : > { %v1144_v31 = vmov %v995_v4  ;;  %v423_v48 = vmul.f32 %v415_v33, %v369_v62  ;;  %v424_v49 = vmul.f32 %v416_v35, %v369_v62  ;;  %v418_v50 = vmul.f32 %v658_v18, %v399_v24 }
 0x3c5   : > { %v419_v4 = vmul.f32 %v658_v18, %v402_v25  ;;  %v428_v53 = vsub.f32 %v757_v42, %v420_v36  ;;  %v429_v54 = vsub.f32 %v753_v47, %v421_v39  ;;  %v430_v56 = vsub.f32 %v749_v38, %v422_v40 }
 0x3c6   : > { %v425_v58 = vmul.f32 %v417_v43, %v369_v62  ;;  %v431_v61 = vsub.f32 %v745_v45, %v423_v48  ;;  %v432_v63 = vsub.f32 %v741_v55, %v424_v49  ;;  %v426_v0 = vmul.f32 %v418_v50, %v369_v62 }
 0x3c7   : > { %v427_v42 = vmul.f32 %v419_v4, %v369_v62  ;;  %v437_v38 = vsel %vm332_vm12, %v436_v23, %v428_v53  ;;  %v438_v47 = vsel %vm333_vm15, %v436_v23, %v429_v54  ;;  %v439_v1 = vsel %vm334_vm0, %v436_v23, %v430_v56  ;;  %vm459_vm12 = vmand %vm338_vm4, %vm901_vm13 }
 0x3c8   : > { %v433_v45 = vsub.f32 %v737_v59, %v425_v58  ;;  %v445_v55 = vsel %vm901_vm13, %v412_v20, %v437_v38  ;;  %v446_v62 = vsel %vm901_vm13, %v413_v21, %v438_v47  ;;  %v447_v2 = vsel %vm901_vm13, %v414_v22, %v439_v1 }
 0x3c9   : > { %v440_v3 = vsel %vm335_vm1, %v436_v23, %v431_v61  ;;  %v462_v7 = vsel %vm1002_vm6, %v461_v32, %v445_v55   ;;  %v463_v47 = vsel %vm1011_vm7, %v461_v32, %v446_v62   ;;  %v464_v38 = vsel %vm1023_vm8, %v461_v32, %v447_v2   ;;  %320 = sbr.rel (!%p318_p0) target bundleno = 773 (0x305), region = 47 }
 0x3ca   : > { %v448_v59 = vsel %vm901_vm13, %v415_v33, %v440_v3  ;;  %v441_v9 = vsel %vm336_vm2, %v436_v23, %v432_v63  ;;  %v442_v10 = vsel %vm337_vm3, %v436_v23, %v433_v45  ;;  %v434_v11 = vsub.f32 %v733_v52, %v426_v0 }
 0x3cb   : > { %v465_v8 = vsel %vm456_vm9, %v461_v32, %v448_v59   ;;  %v449_v12 = vsel %vm901_vm13, %v416_v35, %v441_v9  ;;  %v450_v13 = vsel %vm901_vm13, %v417_v43, %v442_v10  ;;  %v435_v14 = vsub.f32 %v729_v57, %v427_v42 }
 0x3cc   : > { %v466_v55 = vsel %vm457_vm10, %v461_v32, %v449_v12   ;;  %v467_v59 = vsel %vm458_vm11, %v461_v32, %v450_v13   ;;  %v443_v52 = vsel %vm338_vm4, %v436_v23, %v434_v11  ;;  %v1152_v45 = vmov %v465_v8 }
 0x3cd   : > { %v451_v15 = vsel %vm901_vm13, %v418_v50, %v443_v52  ;;  %v444_v16 = vsel %vm339_vm5, %v436_v23, %v435_v14  ;;  %v1153_v42 = vmov %v462_v7  ;;  %v471_v5 = vmul.f32 (%p318_p0), -0.5, %v1144_v31 }
 0x3ce   : > { %v468_v52 = vsel %vm459_vm12, %v461_v32, %v451_v15   ;;  %v452_v57 = vsel %vm901_vm13, %v419_v4, %v444_v16  ;;  %v1151_v4 = vmov %v1144_v31  ;;  %vm472_vm13 = vcmask (%p318_p0), 0  }
 0x3cf   : > { %v469_v57 = vsel %vm460_vm14, %v461_v32, %v452_v57   ;;  %473 = vst.msk [vmem:[#allocation4] sm:$0x1] (%p318_p0), %vm472_vm13, %v471_v5 }
 0x3d0   :  { %670 = shalt.err (!%p667_p5)
}
 0x3d1   :  { %s671_s22 = scalar_lea.hbm %s1141_s3, 16 }
 0x3d2   :  { %p672_p6 = scmp.ne.s32.totalorder %s1141_s3, %s671_s22  ;;  %p675_p7 = scmp.lt.u32.totalorder %s671_s22, %s1141_s3 }
 0x3d4   :  { %p677_p8 = pnand %p675_p7, %p672_p6 }
 0x3d6   :  { %680 = shalt.err (!%p677_p8)
}
 0x3d7   :  { %483 = dma.vmem_to_hbm [thread:$0]  %s481_s2, 16, %s1141_s3, [#allocation5]  }
 0x3d8   :  { %721 = dma.done.wait [#allocation5], 16  }
 0x3d9   :  { %722 = vsyncadd [#allocation5], 4294967280 }
 0x3da   :  { %487 = vsyncpa [#allocation5], 1 }

</bundles_post_ra>
